<compile_context>
chip_gen: v5e
topology: v5e:2x2
jax: 0.10.0
libtpu: 0.0.40
codegen_flags: <defaults>
</compile_context>

<pallas_src>
import functools

import jax
import jax.numpy as jnp
from jax.experimental import pallas as pl
from jax.experimental.pallas import tpu as pltpu

_MIB = 1024 * 1024
COMPUTE_DTYPE = jnp.bfloat16  # MXU-native operand dtype; halves HBM traffic.


def _cdiv(a, b):
    return -(-a // b)


def spectral_mix_kernel(xr_ref, xi_ref, wr_ref, wi_ref, o_ref):
    # xr_ref/xi_ref: (TM, TB, Cin) bf16   mode-major, channels on the lane axis
    # wr_ref/wi_ref: (TM, Cin, Cout) bf16 (un-duplicated real/imag weight planes)
    # o_ref:         (TM, TB, 2*Cout) f32 packed [yr | yi]
    xr = xr_ref[...]
    xi = xi_ref[...]
    wr = wr_ref[...]
    wi = wi_ref[...]
    dot = functools.partial(
        jnp.einsum, "mbi,mio->mbo", preferred_element_type=jnp.float32)
    # (xr + i*xi) @ (wr + i*wi) per mode, 4 real MXU matmuls, f32 accumulation.
    yr = dot(xr, wr) - dot(xi, wi)
    yi = dot(xr, wi) + dot(xi, wr)
    # Single lane-dense packed store (2*Cout lanes).
    o_ref[...] = jnp.concatenate([yr, yi], axis=-1).astype(o_ref.dtype)


def _vmem_capacity_bytes():
    try:
        return int(pltpu.get_tpu_info().vmem_capacity_bytes)
    except Exception:
        return 64 * _MIB  # conservative fallback: v7x per-TensorCore VMEM


def _max_batch_tile():
    try:
        kind = jax.devices()[0].device_kind.lower()
        if "v5" in kind and ("lite" in kind or "v5e" in kind):
            return 128  # v5e: lower HBM BW, single vst slot -> smaller batch tile
    except Exception:
        pass
    return 256


def _pick_tiles(num_modes, batch, cin, cout, itemsize):
    """Generation-aware tile sizes + VMEM limit."""
    vmem_cap = _vmem_capacity_bytes()
    # Tile budget scales with the part: 128 MiB (v5e/v6e) -> ~92 MiB,
    # 64 MiB (v7x) -> ~46 MiB.  vmem_limit gets ~16 MiB of headroom on top.
    budget = min(96 * _MIB, int(0.72 * vmem_cap))
    vmem_limit = int(min(int(0.875 * vmem_cap), budget + 16 * _MIB))

    tb_max = _max_batch_tile()
    if batch <= tb_max:
        tb = batch                       # full dim -> no sublane constraint, no pad
    else:
        tb = tb_max
        for cand in range(tb_max, 7, -8):  # multiple-of-8 divisor -> no batch pad
            if batch % cand == 0:
                tb = cand
                break
    b_blocks = _cdiv(batch, tb)

    # Per-mode per-block bytes (bf16 inputs/weights, f32 output), x2 double-buffer.
    per_mode = itemsize * (2 * tb * cin + 2 * cin * cout) + 4 * tb * 2 * cout
    tm = max(1, budget // (2 * per_mode))
    tm = int(min(tm, num_modes))

    # v7x has 2 TensorCores sharing the grid via dimension_semantics: make sure
    # there are at least 2 parallel grid steps so a core is never idle.
    if b_blocks * _cdiv(num_modes, tm) < 2 and num_modes >= 2:
        tm = min(tm, _cdiv(num_modes, 2))

    return tm, tb, vmem_limit


def spectral_mix(xr, xi, wr, wi):
    """Per-mode complex channel mixing on the MXU.

    xr, xi: (M, B, Cin) bf16;  wr, wi: (M, Cin, Cout) bf16.
    Returns (M, B, 2*Cout) f32 packed [yr | yi] with
    yr + i*yi = (xr + i*xi) @ (wr + i*wi) for every mode.
    """
    M, B, cin = xr.shape
    cout = wr.shape[-1]
    itemsize = jnp.dtype(xr.dtype).itemsize

    tm, tb, vmem_limit = _pick_tiles(M, B, cin, cout, itemsize)

    m_pad = _cdiv(M, tm) * tm
    b_pad = _cdiv(B, tb) * tb
    if m_pad != M:  # pad the (small, mode-sliced) arrays; padded modes are sliced off
        pad_m = ((0, m_pad - M), (0, 0), (0, 0))
        xr = jnp.pad(xr, pad_m)
        xi = jnp.pad(xi, pad_m)
        wr = jnp.pad(wr, pad_m)
        wi = jnp.pad(wi, pad_m)
    if b_pad != B:  # rare fallback: only when B > max tile with no mult-of-8 divisor
        pad_b = ((0, 0), (0, b_pad - B), (0, 0))
        xr = jnp.pad(xr, pad_b)
        xi = jnp.pad(xi, pad_b)

    # Batch innermost -> the (batch-invariant) weight tile stays resident in VMEM
    # across all batch tiles of a mode block (weights DMA'd once per mode block).
    grid = (m_pad // tm, b_pad // tb)

    cost = pl.CostEstimate(
        flops=8 * m_pad * b_pad * cin * cout,  # 4 real matmuls, 2 flops/MAC
        transcendentals=0,
        bytes_accessed=(itemsize * m_pad * (2 * b_pad * cin + 2 * cin * cout)
                        + 4 * m_pad * b_pad * 2 * cout),
    )

    x_spec = pl.BlockSpec((tm, tb, cin), lambda m, b: (m, b, 0))
    w_spec = pl.BlockSpec((tm, cin, cout), lambda m, b: (m, 0, 0))  # batch-invariant

    out = pl.pallas_call(
        spectral_mix_kernel,
        out_shape=jax.ShapeDtypeStruct((m_pad, b_pad, 2 * cout), jnp.float32),
        grid_spec=pltpu.PrefetchScalarGridSpec(
            num_scalar_prefetch=0,
            grid=grid,
            in_specs=[x_spec, x_spec, w_spec, w_spec],
            out_specs=pl.BlockSpec((tm, tb, 2 * cout), lambda m, b: (m, b, 0)),
        ),
        compiler_params=pltpu.CompilerParams(
            dimension_semantics=("parallel", "parallel"),
            vmem_limit_bytes=vmem_limit,
        ),
        cost_estimate=cost,
    )(xr, xi, wr, wi)

    return out[:M, :B, :]


def prepare_spectral_weights(weights1, dtype=COMPUTE_DTYPE):
    """(Cin, Cout, M) complex64 -> mode-major real/imag planes (M, Cin, Cout).

    Hoisted out of the per-call path: call once at parameter-init time.
    """
    wr = jnp.transpose(jnp.real(weights1), (2, 0, 1)).astype(dtype)
    wi = jnp.transpose(jnp.imag(weights1), (2, 0, 1)).astype(dtype)
    return wr, wi


@functools.partial(jax.jit, static_argnums=(3,))
def spectral_conv1d(x, wr_t, wi_t, modes1):
    """SpectralConv1d forward.  x: (B, Cin, N) f32; wr_t/wi_t from
    prepare_spectral_weights; returns (B, Cout, N) f32."""
    B, Cin, N = x.shape
    cout = wr_t.shape[-1]
    n_freq = N // 2 + 1

    # TODO(synk): rfft/irfft have no Pallas TPU primitive; kept in plain JAX/XLA.
    x_ft = jnp.fft.rfft(x, axis=-1)[:, :, :modes1]  # (B, Cin, M) complex64

    # Mode-major layout, channels on the lane axis.  Real/imag stay as two separate
    # planes (no packed-concat HBM materialization); transposes act only on the
    # small mode-sliced array.
    xr = jnp.transpose(jnp.real(x_ft), (2, 0, 1)).astype(COMPUTE_DTYPE)  # (M,B,Cin)
    xi = jnp.transpose(jnp.imag(x_ft), (2, 0, 1)).astype(COMPUTE_DTYPE)

    y = spectral_mix(xr, xi, wr_t, wi_t)              # (M, B, 2*Cout) f32
    yr = jnp.transpose(y[..., :cout], (1, 2, 0))      # (B, Cout, M)
    yi = jnp.transpose(y[..., cout:], (1, 2, 0))

    out_ft = jnp.zeros((B, cout, n_freq), dtype=jnp.complex64)
    out_ft = out_ft.at[:, :, :modes1].set(yr + 1j * yi)
    return jnp.fft.irfft(out_ft, n=N, axis=-1)


if __name__ == "__main__":
    B, Cin, Cout, N, modes1 = 2, 4, 4, 16, 5

    key = jax.random.PRNGKey(0)
    k_x, k_wr, k_wi = jax.random.split(key, 3)

    x = jax.random.normal(k_x, (B, Cin, N), dtype=jnp.float32)

    # deterministic init mirroring torch: scale * rand(cfloat) -> U[0,1) real & imag
    scale = 1.0 / (Cin * Cout)
    w_real = scale * jax.random.uniform(k_wr, (Cin, Cout, modes1), dtype=jnp.float32)
    w_imag = scale * jax.random.uniform(k_wi, (Cin, Cout, modes1), dtype=jnp.float32)
    weights1 = (w_real + 1j * w_imag).astype(jnp.complex64)

    # One-time (parameter-init) weight repacking, outside the per-call path.
    wr_t, wi_t = prepare_spectral_weights(weights1)

    out = spectral_conv1d(x, wr_t, wi_t, modes1)
    out = jax.block_until_ready(out)

    # pure-JAX reference of the full forward (f32 / complex64)
    x_ft = jnp.fft.rfft(x, axis=-1)
    mixed = jnp.einsum("bix,iox->box", x_ft[:, :, :modes1], weights1)
    out_ft_ref = jnp.zeros((B, Cout, N // 2 + 1), dtype=jnp.complex64)
    out_ft_ref = out_ft_ref.at[:, :, :modes1].set(mixed)
    ref = jnp.fft.irfft(out_ft_ref, n=N, axis=-1)

    assert out.shape == (B, Cout, N)
    # Tolerance sized for deliberate bf16 MXU operands (values are O(1)).
    assert jnp.allclose(out, ref, atol=3e-2, rtol=3e-2), \
        float(jnp.max(jnp.abs(out - ref)))

    print("KERNEL_OK")
</pallas_src>

<mosaic_0001>
module attributes {stable_mosaic.version = 11 : i64} {
  func.func @spectral_mix_kernel(%arg0: i32, %arg1: i32, %arg2: memref<3x2x4xbf16, #tpu.memory_space<vmem>>, %arg3: memref<3x2x4xbf16, #tpu.memory_space<vmem>>, %arg4: memref<3x4x4xbf16, #tpu.memory_space<vmem>>, %arg5: memref<3x4x4xbf16, #tpu.memory_space<vmem>>, %arg6: memref<3x2x8xf32, #tpu.memory_space<vmem>>) attributes {dimension_semantics = [#tpu.dimension_semantics<parallel>, #tpu.dimension_semantics<parallel>], iteration_bounds = array<i64: 2, 1>, scalar_prefetch = 0 : i64, scratch_operands = 0 : i64, tpu.core_type = #tpu.core_type<tc>, window_params = [{transform_indices = @transform_0, window_bounds = array<i64: 3, 2, 4>}, {transform_indices = @transform_1, window_bounds = array<i64: 3, 2, 4>}, {transform_indices = @transform_2, window_bounds = array<i64: 3, 4, 4>}, {transform_indices = @transform_3, window_bounds = array<i64: 3, 4, 4>}, {transform_indices = @transform_4, window_bounds = array<i64: 3, 2, 8>}]} {
    %c0 = arith.constant 0 : index
    %c0_0 = arith.constant 0 : index
    %c0_1 = arith.constant 0 : index
    %0 = vector.load %arg2[%c0, %c0_0, %c0_1] : memref<3x2x4xbf16, #tpu.memory_space<vmem>>, vector<3x2x4xbf16>
    %c0_2 = arith.constant 0 : index
    %c0_3 = arith.constant 0 : index
    %c0_4 = arith.constant 0 : index
    %1 = vector.load %arg3[%c0_2, %c0_3, %c0_4] : memref<3x2x4xbf16, #tpu.memory_space<vmem>>, vector<3x2x4xbf16>
    %c0_5 = arith.constant 0 : index
    %c0_6 = arith.constant 0 : index
    %c0_7 = arith.constant 0 : index
    %2 = vector.load %arg4[%c0_5, %c0_6, %c0_7] : memref<3x4x4xbf16, #tpu.memory_space<vmem>>, vector<3x4x4xbf16>
    %c0_8 = arith.constant 0 : index
    %c0_9 = arith.constant 0 : index
    %c0_10 = arith.constant 0 : index
    %3 = vector.load %arg5[%c0_8, %c0_9, %c0_10] : memref<3x4x4xbf16, #tpu.memory_space<vmem>>, vector<3x4x4xbf16>
    "tpu.trace_start"() <{level = 10 : i32, message = "mbi,mio->mbo"}> : () -> ()
    %cst = arith.constant dense<0.000000e+00> : vector<3x2x4xf32>
    %4 = tpu.matmul %0, %2, %cst {dimension_numbers = #tpu.dot_dimension_numbers<[2], [1], [1], [2], [0, 0, 0, 1, 1, 2], [0], [0]>} : vector<3x2x4xbf16>, vector<3x4x4xbf16>, vector<3x2x4xf32> -> vector<3x2x4xf32>
    %cst_11 = arith.constant dense<0.000000e+00> : vector<3x2x4xf32>
    %5 = tpu.matmul %1, %3, %cst_11 {dimension_numbers = #tpu.dot_dimension_numbers<[2], [1], [1], [2], [0, 0, 0, 1, 1, 2], [0], [0]>} : vector<3x2x4xbf16>, vector<3x4x4xbf16>, vector<3x2x4xf32> -> vector<3x2x4xf32>
    "tpu.trace_stop"() : () -> ()
    %6 = arith.subf %4, %5 : vector<3x2x4xf32>
    "tpu.trace_start"() <{level = 10 : i32, message = "mbi,mio->mbo"}> : () -> ()
    %cst_12 = arith.constant dense<0.000000e+00> : vector<3x2x4xf32>
    %7 = tpu.matmul %0, %3, %cst_12 {dimension_numbers = #tpu.dot_dimension_numbers<[2], [1], [1], [2], [0, 0, 0, 1, 1, 2], [0], [0]>} : vector<3x2x4xbf16>, vector<3x4x4xbf16>, vector<3x2x4xf32> -> vector<3x2x4xf32>
    %cst_13 = arith.constant dense<0.000000e+00> : vector<3x2x4xf32>
    %8 = tpu.matmul %1, %2, %cst_13 {dimension_numbers = #tpu.dot_dimension_numbers<[2], [1], [1], [2], [0, 0, 0, 1, 1, 2], [0], [0]>} : vector<3x2x4xbf16>, vector<3x4x4xbf16>, vector<3x2x4xf32> -> vector<3x2x4xf32>
    "tpu.trace_stop"() : () -> ()
    %9 = arith.addf %7, %8 : vector<3x2x4xf32>
    %10 = tpu.concatenate %6, %9 in 2 : vector<3x2x4xf32>, vector<3x2x4xf32> -> vector<3x2x8xf32>
    %c0_14 = arith.constant 0 : index
    %c0_15 = arith.constant 0 : index
    %c0_16 = arith.constant 0 : index
    %11 = vector.load %arg6[%c0_14, %c0_15, %c0_16] : memref<3x2x8xf32, #tpu.memory_space<vmem>>, vector<3x2x8xf32>
    tpu.vector_store %arg6[%c0_14, %c0_15, %c0_16], %10 {strides = array<i32>} : memref<3x2x8xf32, #tpu.memory_space<vmem>>, vector<3x2x8xf32>,
    return
  }
  func.func @transform_0(%arg0: i32, %arg1: i32) -> (i32, i32, i32) {
    %c0_i32 = arith.constant 0 : i32
    %c0_i32_0 = arith.constant 0 : i32
    return %arg0, %arg1, %c0_i32 : i32, i32, i32
  }
  func.func @transform_1(%arg0: i32, %arg1: i32) -> (i32, i32, i32) {
    %c0_i32 = arith.constant 0 : i32
    %c0_i32_0 = arith.constant 0 : i32
    return %arg0, %arg1, %c0_i32 : i32, i32, i32
  }
  func.func @transform_2(%arg0: i32, %arg1: i32) -> (i32, i32, i32) {
    %c0_i32 = arith.constant 0 : i32
    %c0_i32_0 = arith.constant 0 : i32
    %c0_i32_1 = arith.constant 0 : i32
    return %arg0, %c0_i32, %c0_i32_0 : i32, i32, i32
  }
  func.func @transform_3(%arg0: i32, %arg1: i32) -> (i32, i32, i32) {
    %c0_i32 = arith.constant 0 : i32
    %c0_i32_0 = arith.constant 0 : i32
    %c0_i32_1 = arith.constant 0 : i32
    return %arg0, %c0_i32, %c0_i32_0 : i32, i32, i32
  }
  func.func @transform_4(%arg0: i32, %arg1: i32) -> (i32, i32, i32) {
    %c0_i32 = arith.constant 0 : i32
    %c0_i32_0 = arith.constant 0 : i32
    return %arg0, %arg1, %c0_i32 : i32, i32, i32
  }
}

</mosaic_0001>

<bundles_post_ra>
// kernel: reverse.1
= control target key start
LH: loop header
LB: loop body
LE: loop exit
PB: predicated region body
PF: predicated region fallthrough
CT: control target
= control target key end

     0   :  { %s92_s0 = inlined_call_operand.vmem [shape: f32[2,4,7], index: 0, kind: input, shape index: {}]   ;;  %s93_s1 = inlined_call_operand.vmem [shape: f32[2,4,7], index: 1, kind: output, shape index: {}]  }
   0x1   :  { %v28_v0 = vld [vmem:[%s92_s0 + $0xc] sm:$0x3]  ;;  %v29_v1 = vld [vmem:[%s92_s0 + $0xa] sm:$0x3]  ;;  %v31_v2 = vld [vmem:[%s92_s0 + $0x8] sm:$0x3] }
   0x2   :  { %4 = vst [vmem:[%s93_s1] sm:$0x3] %v28_v0  ;;  %v33_v3 = vld [vmem:[%s92_s0 + $0x6] sm:$0x3]  ;;  %v35_v4 = vld [vmem:[%s92_s0 + $0x4] sm:$0x3] }
   0x3   :  { %30 = vst [vmem:[%s93_s1 + $0x2] sm:$0x3] %v29_v1  ;;  %v37_v5 = vld [vmem:[%s92_s0 + $0x2] sm:$0x3]  ;;  %v25_v6 = vld [vmem:[%s92_s0] sm:$0x3] }
   0x4   :  { %32 = vst [vmem:[%s93_s1 + $0x4] sm:$0x3] %v31_v2 }
   0x5   :  { %34 = vst [vmem:[%s93_s1 + $0x6] sm:$0x3] %v33_v3 }
   0x6   :  { %36 = vst [vmem:[%s93_s1 + $0x8] sm:$0x3] %v35_v4 }
   0x7   :  { %38 = vst [vmem:[%s93_s1 + $0xa] sm:$0x3] %v37_v5 }
   0x8   :  { %39 = vst [vmem:[%s93_s1 + $0xc] sm:$0x3] %v25_v6 }

// kernel: spectral_conv1d.1
= control target key start
LH: loop header
LB: loop body
LE: loop exit
PB: predicated region body
PF: predicated region fallthrough
CT: control target
= control target key end

     0   :  { %s740_s15 = smov 0   ;;  %s742_s16 = smov 0   ;;  %s808_s0 = inlined_call_operand.vmem [shape: bf16[6,2,4], index: 0, kind: input, shape index: {}]   ;;  %s809_s1 = inlined_call_operand.vmem [shape: bf16[6,2,4], index: 1, kind: input, shape index: {}]   ;;  %s810_s2 = inlined_call_operand.vmem [shape: bf16[6,4,4], index: 2, kind: input, shape index: {}]   ;;  %s811_s3 = inlined_call_operand.vmem [shape: bf16[6,4,4], index: 3, kind: input, shape index: {}]   ;;  %s812_s4 = inlined_call_operand.vmem [shape: f32[6,2,8], index: 4, kind: output, shape index: {}]  }
   0x1   :  { %s744_s17 = smov 0  }
   0x2 LB: > { %s26_s18 = sadd.s32 1, %s708_s16  ;;  %p647_p0 = scmp.ge.s32.totalorder %s712_s17, 1  ;;  %s712_s17 = sphi %s744_s17, %s14_s17   ;;  %s708_s16 = sphi %s742_s16, %s814_s16   ;;  %s704_s15 = sphi %s740_s15, %s813_s15  }
   0x3   : > { %p28_p1 = scmp.ge.s32.totalorder %s26_s18, 2  ;;  %p218_p2 = scmp.lt.s32.totalorder %s712_s17, 3 }
   0x5   : > { %s816_s18 = smov (%p28_p1, %s26_s18), 0  ;;  %p219_p3 = pnand %p647_p0, %p218_p2 }
   0x6   : > { %s266_s19 = smul.u32 (!%p219_p3), 3, %s704_s15  ;;  %s714_s7 = smov (!%p219_p3), 4  }
   0x7   : > { %222 = sbr.rel (%p219_p3) target bundleno = 306 (0x132), region = 36 }
   0x8   : > { %p267_p4 = scmp.lt.s32.totalorder (!%p219_p3), %s266_s19, 5 }
   0xc   : > { %s818_s19 = smov (!%p267_p4, %s266_s19), 5  ;;  %vm320_vm0 = vcmask 1041408   ;;  %vm316_vm1 = vcmask 31744   ;;  %vm528_vm2 = vcmask 58368  }
   0xd   : > { %s758_s20 = sshll.u32 %s818_s19, 1  ;;  %s272_s23 = scalar_lea.vmem %s808_s0, %s818_s19 }
   0xe   : > { %s286_s26 = scalar_lea.vmem %s810_s2, %s758_s20  ;;  %s292_s29 = scalar_lea.vmem %s811_s3, %s758_s20  ;;  %v304_v3 = vld [vmem:[%s272_s23] sm:$0x1]  ;;  %v305_v4 = vld [vmem:[%s272_s23 + $0x1] sm:$0x1]  ;;  %v306_v10 = vld [vmem:[%s272_s23 + $0x2] sm:$0x1] }
   0xf   : > { %v310_v0 = vld [vmem:[%s286_s26] sm:$0x3]  ;;  %v311_v1 = vld [vmem:[%s286_s26 + $0x2] sm:$0x3]  ;;  %v312_v2 = vld [vmem:[%s286_s26 + $0x4] sm:$0x3]  ;;  %s280_s6 = scalar_lea.vmem %s809_s1, %s818_s19  ;;  %s301_s10 = scalar_lea.vmem %s812_s4, %s758_s20 }
  0x10   : > { %v322_v5 = vsel %vm320_vm0, %v310_v0, 0  ;;  %v341_v6 = vsel %vm320_vm0, %v311_v1, 0  ;;  %v360_v7 = vsel %vm320_vm0, %v312_v2, 0  ;;  %v313_v8 = vld [vmem:[%s292_s29] sm:$0x3] }
  0x11   : > { %331 = vmatpush.bf16.msra.mxu0 %v322_v5  ;;  %350 = vmatpush.bf16.msra.mxu1 %v341_v6  ;;  %v379_v9 = vsel %vm320_vm0, %v313_v8, 0  ;;  %v315_v11 = vld [vmem:[%s292_s29 + $0x4] sm:$0x3]  ;;  %v307_v12 = vld [vmem:[%s280_s6] sm:$0x1] }
  0x12   : > { %369 = vmatpush.bf16.msra.mxu2 %v360_v7  ;;  %388 = vmatpush.bf16.msra.mxu3 %v379_v9  ;;  %v417_v13 = vsel %vm320_vm0, %v315_v11, 0  ;;  %v314_v14 = vld [vmem:[%s292_s29 + $0x2] sm:$0x3]  ;;  %v308_v16 = vld [vmem:[%s280_s6 + $0x1] sm:$0x1] }
  0x13   : > { %v398_v15 = vsel %vm320_vm0, %v314_v14, 0  ;;  %v309_v17 = vld [vmem:[%s280_s6 + $0x2] sm:$0x1] }
  0x14   : > { %651 = vmatmul.msk.bf16.vlgmr.msra.gmra.mxu0 %vm316_vm1, %v304_v3  ;;  %652 = vmatmul.msk.bf16.vlgmr.msra.gmra.mxu1 %vm316_vm1, %v305_v4 }
  0x15   : > { %426 = vmatpush.bf16.msrb.mxu1 %v417_v13  ;;  %653 = vmatmul.msk.bf16.vlgmr.msra.gmra.mxu2 %vm316_vm1, %v306_v10 }
  0x16   : > { %442 = vmatpush.bf16.msrb.mxu2 %v322_v5  ;;  %654 = vmatmul.msk.bf16.vlgmr.msra.gmra.mxu3 %vm316_vm1, %v307_v12 }
  0x17   : > { %455 = vmatpush.bf16.msrb.mxu3 %v341_v6  ;;  %407 = vmatpush.bf16.msrb.mxu0 %v398_v15 }
  0x19   : > { %481 = vmatpush.bf16.msra.mxu1 %v379_v9 }
  0x1a   : > { %494 = vmatpush.bf16.msra.mxu2 %v398_v15 }
  0x1b   : > { %507 = vmatpush.bf16.msra.mxu3 %v417_v13  ;;  %468 = vmatpush.bf16.msra.mxu0 %v360_v7 }
  0x24   : > { %655 = vmatmul.msk.bf16.vlgmr.msrb.gmra.mxu0 %vm316_vm1, %v308_v16  ;;  %656 = vmatmul.msk.bf16.vlgmr.msrb.gmra.mxu1 %vm316_vm1, %v309_v17 }
  0x25   : > { %657 = vmatmul.msk.bf16.vlgmr.msrb.gmra.mxu2 %vm316_vm1, %v307_v12 }
  0x26   : > { %658 = vmatmul.msk.bf16.vlgmr.msrb.gmra.mxu3 %vm316_vm1, %v308_v16 }
  0x34   : > { %660 = vmatmul.msk.bf16.vlgmr.msra.gmra.mxu1 %vm316_vm1, %v304_v3  ;;  %659 = vmatmul.msk.bf16.vlgmr.msra.gmra.mxu0 %vm316_vm1, %v309_v17 }
  0x35   : > { %661 = vmatmul.msk.bf16.vlgmr.msra.gmra.mxu2 %vm316_vm1, %v305_v4 }
  0x36   : > { %662 = vmatmul.msk.bf16.vlgmr.msra.gmra.mxu3 %vm316_vm1, %v306_v10 }
  0x91   : > { %v333_v18 = vpop.f32.mrf.mxu0  ;;  %v352_v19 = vpop.f32.mrf.mxu1 }
  0x98   : > { %v371_v20 = vpop.f32.mrf.mxu2 }
  0x99   : > { %v390_v21 = vpop.f32.mrf.mxu3  ;;  %v335_v23 = vpop.f32.mrf.mxu0 }
  0x9a   : > { %v432_v22 = vsub.f32 %v333_v18, %v390_v21  ;;  %v354_v24 = vpop.f32.mrf.mxu1 }
  0xa0   : > { %v373_v25 = vpop.f32.mrf.mxu2 }
  0xa1   : > { %v392_v26 = vpop.f32.mrf.mxu3  ;;  %v409_v27 = vpop.f32.mrf.mxu0 }
  0xa2   : > { %v428_v28 = vpop.f32.mrf.mxu1  ;;  %v433_v29 = vsub.f32 %v352_v19, %v409_v27 }
  0xa3   : > { %v434_v30 = vsub.f32 %v371_v20, %v428_v28 }
  0xa8   : > { %v444_v31 = vpop.f32.mrf.mxu2 }
  0xa9   : > { %v457_v32 = vpop.f32.mrf.mxu3  ;;  %v411_v34 = vpop.f32.mrf.mxu0 }
  0xaa   : > { %v430_v33 = vpop.f32.mrf.mxu1 }
  0xb0   : > { %v446_v35 = vpop.f32.mrf.mxu2 }
  0xb1   : > { %v459_v36 = vpop.f32.mrf.mxu3  ;;  %v470_v38 = vpop.f32.mrf.mxu0 }
  0xb2   : > { %v483_v37 = vpop.f32.mrf.mxu1 }
  0xb3   : > { %v484_v39 = vadd.f32 %v483_v37, %v444_v31 }
  0xb5   : > { %516 = vrot.lane.b32.xlu0 %v484_v39, %s714_s7 }
  0xb8   : > { %v496_v40 = vpop.f32.mrf.mxu2 }
  0xb9   : > { %v509_v41 = vpop.f32.mrf.mxu3  ;;  %v472_v44 = vpop.f32.mrf.mxu0  ;;  %v497_v45 = vadd.f32 %v496_v40, %v457_v32 }
  0xba   : > { %v510_v42 = vadd.f32 %v509_v41, %v470_v38  ;;  %v485_v43 = vpop.f32.mrf.mxu1 }
  0xbc   : > { %520 = vrot.lane.b32.xlu1 %v510_v42, %s714_s7 }
  0xbd   : > { %518 = vrot.lane.b32.xlu0 %v497_v45, %s714_s7 }
  0xc0   : > { %v498_v46 = vpop.f32.mrf.mxu2 }
  0xc1   : > { %v511_v47 = vpop.f32.mrf.mxu3 }
 0x127   : > { %v517_v48 = vpop.permute.xlu0 %516 }
 0x128   : > { %v525_v49 = vsel %vm316_vm1, %v432_v22, %v517_v48 }
 0x129   : > { %529 = vst.msk [vmem:[%s301_s10] sm:$0x3] %vm528_vm2, %v525_v49 }
 0x12e   : > { %v521_v50 = vpop.permute.xlu1 %520 }
 0x12f   : > { %v519_v51 = vpop.permute.xlu0 %518  ;;  %v527_v53 = vsel %vm316_vm1, %v434_v30, %v521_v50 }
 0x130   : > { %v526_v52 = vsel %vm316_vm1, %v433_v29, %v519_v51  ;;  %531 = vst.msk [vmem:[%s301_s10 + $0x4] sm:$0x3] %vm528_vm2, %v527_v53 }
 0x131   : > { %530 = vst.msk [vmem:[%s301_s10 + $0x2] sm:$0x3] %vm528_vm2, %v526_v52 }
 0x132 PF: > { %s14_s17 = sadd.s32 1, %s712_s17   ;;  %s813_s15 = smov %s708_s16 }
 0x133   : > { %p11_p5 = scmp.ge.s32.totalorder %s14_s17, 4   ;;  %s814_s16 = smov %s816_s18 }
 0x135   :  { %13 = sbr.rel (!%p11_p5) target bundleno = 2 (0x2), region = 75 }

</bundles_post_ra>
